<compile_context>
chip_gen: v7x
topology: tpu7x:2x2x1
jax: 0.10.0
libtpu: 0.0.40
codegen_flags: <defaults>
</compile_context>

<pallas_src>
import math

import jax
import jax.numpy as jnp
import numpy as np
from jax import lax
from jax.experimental import pallas as pl
from jax.experimental.pallas import tpu as pltpu


def external_attention_kernel(
    x_ref,    # (Bblk, C, N)  input block (also the residual)
    wa_ref,   # (K, C)        fused: w0 @ w_conv1
    ba_ref,   # (K, 1)        fused: w0 @ b_conv1
    wb_ref,   # (C, K)        fused: bn_scale * (w_conv2 @ w1)
    bb_ref,   # (C, 1)        fused: bn_bias - bn_scale * running_mean
    o_ref,    # (Bblk, C, N)
):
    bblk = x_ref.shape[0]

    # Hoist the (tiny) fused weights out of the per-image loop.
    wa = wa_ref[...]
    ba = ba_ref[...]
    wb = wb_ref[...]
    bb = bb_ref[...]

    def body(i, carry):
        x = x_ref[i]  # (C, N)  residual input for this image

        # fused conv1 + linear_0:  attn = (w0 @ w_conv1) @ x + w0 @ b_conv1
        attn = jnp.dot(wa, x, preferred_element_type=jnp.float32) + ba  # (K, N)

        # softmax over the spatial dim (last axis)
        m = jnp.max(attn, axis=-1, keepdims=True)
        e = jnp.exp(attn - m)
        attn = e * pl.reciprocal(jnp.sum(e, axis=-1, keepdims=True))

        # re-normalise over the K dim (dim=1 in the PyTorch (B, K, N))
        attn = attn * pl.reciprocal(1e-9 + jnp.sum(attn, axis=0, keepdims=True))

        # fused linear_1 + conv2 + BN(eval):  y = W_b @ attn + b_b
        y = jnp.dot(wb, attn, preferred_element_type=jnp.float32) + bb  # (C, N)

        # residual + ReLU
        o_ref[i] = jnp.maximum(y + x, 0.0)
        return carry

    lax.fori_loop(0, bblk, body, 0, unroll=True)


def _vmem_limit_bytes():
    """Pick a scoped-VMEM limit that is safe across v5e/v6e (128 MiB) and v7x (64 MiB)."""
    try:
        cap = pltpu.get_tpu_info().vmem_capacity_bytes
    except Exception:
        cap = 64 << 20  # conservative fallback (v7x-sized)
    return min(int(cap * 0.75), 100 << 20)


def _pick_batch_block(b, c, k, n, budget_bytes):
    """Largest divisor of b whose per-step footprint fits the VMEM budget."""
    best = 1
    for cand in range(1, b + 1):
        if b % cand:
            continue
        # 2x double-buffered input + 2x double-buffered output + (K,N) attn live
        per_step = cand * n * 4 * (2 * c + 2 * c + k)
        if per_step <= budget_bytes:
            best = cand
    return best


def external_attention(x_nchw, params):
    """x_nchw: (B, C, H, W) float32. Returns (B, C, H, W)."""
    b, c, h, w = x_nchw.shape
    n = h * w
    k = params["w0"].shape[0]
    x_flat = x_nchw.reshape(b, c, n)

    # One-time, tiny, host-side weight fusion (exact up to f32 rounding).
    wa = jnp.dot(params["w0"], params["w_conv1"])                     # (K, C)
    ba = jnp.dot(params["w0"], params["b_conv1"])                     # (K, 1)
    wb = params["bn_scale"] * jnp.dot(params["w_conv2"], params["w1"])  # (C, K)
    bb = params["bn_bias"]                                            # (C, 1)

    vmem_limit = _vmem_limit_bytes()
    bblk = _pick_batch_block(b, c, k, n, budget_bytes=vmem_limit // 2)
    grid = (b // bblk,)

    full2d = lambda i: (0, 0)
    out = pl.pallas_call(
        external_attention_kernel,
        out_shape=jax.ShapeDtypeStruct((b, c, n), jnp.float32),
        grid_spec=pltpu.PrefetchScalarGridSpec(
            num_scalar_prefetch=0,
            grid=grid,
            in_specs=[
                pl.BlockSpec((bblk, c, n), lambda i: (i, 0, 0)),
                pl.BlockSpec((k, c), full2d),
                pl.BlockSpec((k, 1), full2d),
                pl.BlockSpec((c, k), full2d),
                pl.BlockSpec((c, 1), full2d),
            ],
            out_specs=pl.BlockSpec((bblk, c, n), lambda i: (i, 0, 0)),
        ),
        compiler_params=pltpu.CompilerParams(
            dimension_semantics=("parallel",),
            vmem_limit_bytes=vmem_limit,
        ),
    )(x_flat, wa, ba, wb, bb)
    return out.reshape(b, c, h, w)


def init_params(key, c, k=64):
    """Deterministic init mirroring the PyTorch module's __init__ scales."""
    k1, k2, k3, k4 = jax.random.split(key, 4)
    # Conv2d 1x1: normal(0, sqrt(2 / (1*1*out_channels)))
    std_conv2d = math.sqrt(2.0 / c)
    w_conv1 = std_conv2d * jax.random.normal(k1, (c, c), jnp.float32)
    # conv1 bias: small deterministic init
    b_conv1 = (0.1 * jax.random.normal(k2, (c,), jnp.float32)).reshape(c, 1)
    # Conv1d c->k: normal(0, sqrt(2 / out_channels)) with out_channels = k
    std_lin0 = math.sqrt(2.0 / k)
    w0 = std_lin0 * jax.random.normal(k3, (k, c), jnp.float32)
    # linear_1 weight is tied to linear_0 (permuted) as in the module
    w1 = w0.T
    w_conv2 = std_conv2d * jax.random.normal(k4, (c, c), jnp.float32)
    # BatchNorm (eval): weight=1, bias=0, running_mean=0, running_var=1
    eps = 1e-5
    bn_scale = jnp.full((c, 1), 1.0 / math.sqrt(1.0 + eps), jnp.float32)
    bn_bias = jnp.zeros((c, 1), jnp.float32)
    return dict(
        w_conv1=w_conv1,
        b_conv1=b_conv1,
        w0=w0,
        w1=w1,
        w_conv2=w_conv2,
        bn_scale=bn_scale,
        bn_bias=bn_bias,
    )


def external_attention_ref(x_nchw, params):
    """Pure-JAX reference (unfused, mirrors the PyTorch forward) for validation."""
    b, c, h, w = x_nchw.shape
    n = h * w
    x = x_nchw.reshape(b, c, n)
    idn = x
    x1 = jnp.einsum("oc,bcn->bon", params["w_conv1"], x) + params["b_conv1"][None]
    attn = jnp.einsum("kc,bcn->bkn", params["w0"], x1)
    attn = jax.nn.softmax(attn, axis=-1)
    attn = attn / (1e-9 + jnp.sum(attn, axis=1, keepdims=True))
    x2 = jnp.einsum("ck,bkn->bcn", params["w1"], attn)
    y = jnp.einsum("oc,bcn->bon", params["w_conv2"], x2)
    y = y * params["bn_scale"][None] + params["bn_bias"][None]
    out = jnp.maximum(y + idn, 0.0)
    return out.reshape(b, c, h, w)


if __name__ == "__main__":
    key = jax.random.PRNGKey(0)
    kx, kp = jax.random.split(key)

    B, C, H, W = 2, 4, 16, 16
    x = jax.random.normal(kx, (B, C, H, W), jnp.float32)
    params = init_params(kp, C, k=64)

    out = external_attention(x, params)
    out = jax.block_until_ready(out)

    ref = jax.block_until_ready(external_attention_ref(x, params))
    assert out.shape == (B, C, H, W)
    # Offline weight fusion changes f32 summation order slightly -> 1e-4 rtol.
    np.testing.assert_allclose(np.asarray(out), np.asarray(ref), rtol=1e-4, atol=1e-5)

    print("KERNEL_OK")
</pallas_src>

<mosaic_0001>
module attributes {stable_mosaic.version = 11 : i64} {
  func.func @external_attention_kernel(%arg0: i32, %arg1: memref<2x4x256xf32, #tpu.memory_space<vmem>>, %arg2: memref<64x4xf32, #tpu.memory_space<vmem>>, %arg3: memref<64x1xf32, #tpu.memory_space<vmem>>, %arg4: memref<4x64xf32, #tpu.memory_space<vmem>>, %arg5: memref<4x1xf32, #tpu.memory_space<vmem>>, %arg6: memref<2x4x256xf32, #tpu.memory_space<vmem>>) attributes {dimension_semantics = [#tpu.dimension_semantics<parallel>], iteration_bounds = array<i64: 1>, scalar_prefetch = 0 : i64, scratch_operands = 0 : i64, tpu.core_type = #tpu.core_type<tc>, window_params = [{transform_indices = @transform_0, window_bounds = array<i64: 2, 4, 256>}, {pipeline_mode = #tpu.pipeline_mode<synchronous>, transform_indices = @transform_1, window_bounds = array<i64: 64, 4>}, {pipeline_mode = #tpu.pipeline_mode<synchronous>, transform_indices = @transform_2, window_bounds = array<i64: 64, 1>}, {pipeline_mode = #tpu.pipeline_mode<synchronous>, transform_indices = @transform_3, window_bounds = array<i64: 4, 64>}, {pipeline_mode = #tpu.pipeline_mode<synchronous>, transform_indices = @transform_4, window_bounds = array<i64: 4, 1>}, {transform_indices = @transform_5, window_bounds = array<i64: 2, 4, 256>}]} {
    %c0 = arith.constant 0 : index
    %c0_0 = arith.constant 0 : index
    %0 = vector.load %arg2[%c0, %c0_0] : memref<64x4xf32, #tpu.memory_space<vmem>>, vector<64x4xf32>
    %c0_1 = arith.constant 0 : index
    %c0_2 = arith.constant 0 : index
    %1 = vector.load %arg3[%c0_1, %c0_2] : memref<64x1xf32, #tpu.memory_space<vmem>>, vector<64x1xf32>
    %c0_3 = arith.constant 0 : index
    %c0_4 = arith.constant 0 : index
    %2 = vector.load %arg4[%c0_3, %c0_4] : memref<4x64xf32, #tpu.memory_space<vmem>>, vector<4x64xf32>
    %c0_5 = arith.constant 0 : index
    %c0_6 = arith.constant 0 : index
    %3 = vector.load %arg5[%c0_5, %c0_6] : memref<4x1xf32, #tpu.memory_space<vmem>>, vector<4x1xf32>
    %c0_i32 = arith.constant 0 : i32
    %4 = arith.index_cast %c0_i32 : i32 to index
    %c0_7 = arith.constant 0 : index
    %c0_8 = arith.constant 0 : index
    %5 = vector.load %arg1[%4, %c0_7, %c0_8] : memref<2x4x256xf32, #tpu.memory_space<vmem>>, vector<1x4x256xf32>
    %6 = vector.shape_cast %5 : vector<1x4x256xf32> to vector<4x256xf32>
    %cst = arith.constant dense<0.000000e+00> : vector<64x256xf32>
    %7 = tpu.matmul %0, %6, %cst {dimension_numbers = #tpu.dot_dimension_numbers<[1], [0], [0], [1], [0, 0, 1, 1], [], []>} : vector<64x4xf32>, vector<4x256xf32>, vector<64x256xf32> -> vector<64x256xf32>
    %8 = vector.broadcast %1 : vector<64x1xf32> to vector<64x256xf32>
    %9 = arith.addf %7, %8 : vector<64x256xf32>
    %cst_9 = arith.constant dense<0xFF800000> : vector<64xf32>
    %10 = vector.multi_reduction <maximumf>, %9, %cst_9 [1] : vector<64x256xf32> to vector<64xf32>
    %11 = vector.shape_cast %10 : vector<64xf32> to vector<64x1xf32>
    %12 = vector.broadcast %11 : vector<64x1xf32> to vector<64x256xf32>
    %13 = arith.subf %9, %12 : vector<64x256xf32>
    %14 = math.exp %13 : vector<64x256xf32>
    %cst_10 = arith.constant dense<0.000000e+00> : vector<64xf32>
    %15 = vector.multi_reduction <add>, %14, %cst_10 [1] : vector<64x256xf32> to vector<64xf32>
    %16 = vector.shape_cast %15 : vector<64xf32> to vector<64x1xf32>
    %17 = tpu.reciprocal %16 : vector<64x1xf32> -> vector<64x1xf32>
    %18 = vector.broadcast %17 : vector<64x1xf32> to vector<64x256xf32>
    %19 = arith.mulf %14, %18 : vector<64x256xf32>
    %cst_11 = arith.constant dense<0.000000e+00> : vector<256xf32>
    %20 = vector.multi_reduction <add>, %19, %cst_11 [0] : vector<64x256xf32> to vector<256xf32>
    %21 = vector.shape_cast %20 : vector<256xf32> to vector<1x256xf32>
    %cst_12 = arith.constant 9.99999971E-10 : f32
    %22 = vector.broadcast %cst_12 : f32 to vector<1x256xf32>
    %23 = arith.addf %22, %21 : vector<1x256xf32>
    %24 = tpu.reciprocal %23 : vector<1x256xf32> -> vector<1x256xf32>
    %25 = vector.broadcast %24 : vector<1x256xf32> to vector<64x256xf32>
    %26 = arith.mulf %19, %25 : vector<64x256xf32>
    %cst_13 = arith.constant dense<0.000000e+00> : vector<4x256xf32>
    %27 = tpu.matmul %2, %26, %cst_13 {dimension_numbers = #tpu.dot_dimension_numbers<[1], [0], [0], [1], [0, 0, 1, 1], [], []>} : vector<4x64xf32>, vector<64x256xf32>, vector<4x256xf32> -> vector<4x256xf32>
    %28 = vector.broadcast %3 : vector<4x1xf32> to vector<4x256xf32>
    %29 = arith.addf %27, %28 : vector<4x256xf32>
    %30 = arith.addf %29, %6 : vector<4x256xf32>
    %cst_14 = arith.constant 0.000000e+00 : f32
    %31 = vector.broadcast %cst_14 : f32 to vector<4x256xf32>
    %32 = arith.maximumf %30, %31 : vector<4x256xf32>
    %33 = arith.index_cast %c0_i32 : i32 to index
    %c0_15 = arith.constant 0 : index
    %c0_16 = arith.constant 0 : index
    %34 = vector.load %arg6[%33, %c0_15, %c0_16] : memref<2x4x256xf32, #tpu.memory_space<vmem>>, vector<1x4x256xf32>
    %35 = vector.shape_cast %34 : vector<1x4x256xf32> to vector<4x256xf32>
    %36 = vector.shape_cast %32 : vector<4x256xf32> to vector<1x4x256xf32>
    tpu.vector_store %arg6[%33, %c0_15, %c0_16], %36 {strides = array<i32>} : memref<2x4x256xf32, #tpu.memory_space<vmem>>, vector<1x4x256xf32>,
    %c1_i32 = arith.constant 1 : i32
    %37 = arith.index_cast %c1_i32 : i32 to index
    %c0_17 = arith.constant 0 : index
    %c0_18 = arith.constant 0 : index
    %38 = vector.load %arg1[%37, %c0_17, %c0_18] : memref<2x4x256xf32, #tpu.memory_space<vmem>>, vector<1x4x256xf32>
    %39 = vector.shape_cast %38 : vector<1x4x256xf32> to vector<4x256xf32>
    %cst_19 = arith.constant dense<0.000000e+00> : vector<64x256xf32>
    %40 = tpu.matmul %0, %39, %cst_19 {dimension_numbers = #tpu.dot_dimension_numbers<[1], [0], [0], [1], [0, 0, 1, 1], [], []>} : vector<64x4xf32>, vector<4x256xf32>, vector<64x256xf32> -> vector<64x256xf32>
    %41 = vector.broadcast %1 : vector<64x1xf32> to vector<64x256xf32>
    %42 = arith.addf %40, %41 : vector<64x256xf32>
    %cst_20 = arith.constant dense<0xFF800000> : vector<64xf32>
    %43 = vector.multi_reduction <maximumf>, %42, %cst_20 [1] : vector<64x256xf32> to vector<64xf32>
    %44 = vector.shape_cast %43 : vector<64xf32> to vector<64x1xf32>
    %45 = vector.broadcast %44 : vector<64x1xf32> to vector<64x256xf32>
    %46 = arith.subf %42, %45 : vector<64x256xf32>
    %47 = math.exp %46 : vector<64x256xf32>
    %cst_21 = arith.constant dense<0.000000e+00> : vector<64xf32>
    %48 = vector.multi_reduction <add>, %47, %cst_21 [1] : vector<64x256xf32> to vector<64xf32>
    %49 = vector.shape_cast %48 : vector<64xf32> to vector<64x1xf32>
    %50 = tpu.reciprocal %49 : vector<64x1xf32> -> vector<64x1xf32>
    %51 = vector.broadcast %50 : vector<64x1xf32> to vector<64x256xf32>
    %52 = arith.mulf %47, %51 : vector<64x256xf32>
    %cst_22 = arith.constant dense<0.000000e+00> : vector<256xf32>
    %53 = vector.multi_reduction <add>, %52, %cst_22 [0] : vector<64x256xf32> to vector<256xf32>
    %54 = vector.shape_cast %53 : vector<256xf32> to vector<1x256xf32>
    %cst_23 = arith.constant 9.99999971E-10 : f32
    %55 = vector.broadcast %cst_23 : f32 to vector<1x256xf32>
    %56 = arith.addf %55, %54 : vector<1x256xf32>
    %57 = tpu.reciprocal %56 : vector<1x256xf32> -> vector<1x256xf32>
    %58 = vector.broadcast %57 : vector<1x256xf32> to vector<64x256xf32>
    %59 = arith.mulf %52, %58 : vector<64x256xf32>
    %cst_24 = arith.constant dense<0.000000e+00> : vector<4x256xf32>
    %60 = tpu.matmul %2, %59, %cst_24 {dimension_numbers = #tpu.dot_dimension_numbers<[1], [0], [0], [1], [0, 0, 1, 1], [], []>} : vector<4x64xf32>, vector<64x256xf32>, vector<4x256xf32> -> vector<4x256xf32>
    %61 = vector.broadcast %3 : vector<4x1xf32> to vector<4x256xf32>
    %62 = arith.addf %60, %61 : vector<4x256xf32>
    %63 = arith.addf %62, %39 : vector<4x256xf32>
    %cst_25 = arith.constant 0.000000e+00 : f32
    %64 = vector.broadcast %cst_25 : f32 to vector<4x256xf32>
    %65 = arith.maximumf %63, %64 : vector<4x256xf32>
    %66 = arith.index_cast %c1_i32 : i32 to index
    %c0_26 = arith.constant 0 : index
    %c0_27 = arith.constant 0 : index
    %67 = vector.load %arg6[%66, %c0_26, %c0_27] : memref<2x4x256xf32, #tpu.memory_space<vmem>>, vector<1x4x256xf32>
    %68 = vector.shape_cast %67 : vector<1x4x256xf32> to vector<4x256xf32>
    %69 = vector.shape_cast %65 : vector<4x256xf32> to vector<1x4x256xf32>
    tpu.vector_store %arg6[%66, %c0_26, %c0_27], %69 {strides = array<i32>} : memref<2x4x256xf32, #tpu.memory_space<vmem>>, vector<1x4x256xf32>,
    %c2_i32 = arith.constant 2 : i32
    return
  }
  func.func @transform_0(%arg0: i32) -> (i32, i32, i32) {
    %c0_i32 = arith.constant 0 : i32
    %c0_i32_0 = arith.constant 0 : i32
    %c0_i32_1 = arith.constant 0 : i32
    return %arg0, %c0_i32, %c0_i32_0 : i32, i32, i32
  }
  func.func @transform_1(%arg0: i32) -> (i32, i32) {
    %c0_i32 = arith.constant 0 : i32
    %c0_i32_0 = arith.constant 0 : i32
    %c0_i32_1 = arith.constant 0 : i32
    return %c0_i32, %c0_i32_0 : i32, i32
  }
  func.func @transform_2(%arg0: i32) -> (i32, i32) {
    %c0_i32 = arith.constant 0 : i32
    %c0_i32_0 = arith.constant 0 : i32
    %c0_i32_1 = arith.constant 0 : i32
    return %c0_i32, %c0_i32_0 : i32, i32
  }
  func.func @transform_3(%arg0: i32) -> (i32, i32) {
    %c0_i32 = arith.constant 0 : i32
    %c0_i32_0 = arith.constant 0 : i32
    %c0_i32_1 = arith.constant 0 : i32
    return %c0_i32, %c0_i32_0 : i32, i32
  }
  func.func @transform_4(%arg0: i32) -> (i32, i32) {
    %c0_i32 = arith.constant 0 : i32
    %c0_i32_0 = arith.constant 0 : i32
    %c0_i32_1 = arith.constant 0 : i32
    return %c0_i32, %c0_i32_0 : i32, i32
  }
  func.func @transform_5(%arg0: i32) -> (i32, i32, i32) {
    %c0_i32 = arith.constant 0 : i32
    %c0_i32_0 = arith.constant 0 : i32
    %c0_i32_1 = arith.constant 0 : i32
    return %arg0, %c0_i32, %c0_i32_0 : i32, i32, i32
  }
}

</mosaic_0001>

<bundles_post_ra>
// kernel: tpu_custom_call.1
= control target key start
LH: loop header
LB: loop body
LE: loop exit
PB: predicated region body
PF: predicated region fallthrough
CT: control target
= control target key end

     0   :  { %vm107_vm0 = vcmask 1043456   ;;  %v1058_v2 = vmov 0.0   ;;  %vm82_vm1 = vcmask 31744   ;;  %v1059_v4 = vmov 0   ;;  %s1433_s0 = inlined_call_operand.vmem [shape: f32[2,4,256], index: 0, kind: input, shape index: {}]   ;;  %s1434_s1 = inlined_call_operand.vmem [shape: f32[64,4], index: 1, kind: input, shape index: {}]   ;;  %s1435_s2 = inlined_call_operand.vmem [shape: f32[64,1], index: 2, kind: input, shape index: {}]   ;;  %s1436_s3 = inlined_call_operand.vmem [shape: f32[4,64], index: 3, kind: input, shape index: {}]   ;;  %s1437_s4 = inlined_call_operand.vmem [shape: f32[4,1], index: 4, kind: input, shape index: {}]   ;;  %s1438_s5 = inlined_call_operand.hbm [shape: f32[2,4,256], index: 5, kind: output, shape index: {}]  }
   0x1   :  { %v1096_v0 = vld [vmem:[%s1433_s0] sm:$0xff]  ;;  %176 = vmatprep.mubr.f32.mxu0 %v1058_v2  ;;  %464 = vmatprep.mubr.f32.mxu1 %v1058_v2  ;;  %v31_v6 = vld [vmem:[%s1435_s2 + $0x10] sm:$0xff]  ;;  %v30_v7 = vld [vmem:[%s1435_s2 + $0x8] sm:$0xff] }
   0x2   :  { %v1100_v1 = vcombine.high %v1096_v0, %v1096_v0  ;;  %v1107_v3 = vld [vmem:[%s1434_s1] sm:$0xff]  ;;  %926 = vset.pattern.permute.xlu0 %v1059_v4  ;;  %927 = vset.pattern.permute.xlu1 %v1059_v4 }
   0x3   :  { %v29_v5 = vld [vmem:[%s1435_s2] sm:$0xff]  ;;  %52 = vperm.xlu1 %927, %v31_v6  }
   0x4   :  { %866 = vmatprep.subr.msk.mxu0 %vm107_vm0, %v1100_v1  ;;  %42 = vperm.xlu0 %926, %v29_v5  }
   0x5   :  { %867 = vmatpush1.msk.msra.mxu0 %vm107_vm0, %v1096_v0 }
   0x6   :  { %868 = vmatmul.mubr.msk.f32.vlgmr.msra.gmra.mrb[0].mxu0 %vm82_vm1, %v1107_v3 }
   0x7   :  { %10 = vsyncpa [#allocation3], 0  ;;  %182 = vmatprep.mubr.f32.mxu0 %v1058_v2  ;;  %v1128_v8 = vld [vmem:[%s1434_s1 + $0x8] sm:$0xff]  ;;  %v32_v9 = vld [vmem:[%s1435_s2 + $0x18] sm:$0xff]  ;;  %vm396_vm2 = vcmask 523264  }
   0x8   :  { %47 = vperm.xlu0 %926, %v30_v7   ;;  %57 = vperm.xlu1 %927, %v32_v9   ;;  %v33_v10 = vld [vmem:[%s1435_s2 + $0x20] sm:$0xff]  ;;  %v1142_v11 = vld [vmem:[%s1434_s1 + $0x10] sm:$0xff]  ;;  %v34_v12 = vld [vmem:[%s1435_s2 + $0x28] sm:$0xff] }
   0x9   :  { %v35_v13 = vld [vmem:[%s1435_s2 + $0x30] sm:$0xff]  ;;  %v1156_v14 = vld [vmem:[%s1434_s1 + $0x18] sm:$0xff]  ;;  %v1167_v16 = vld [vmem:[%s1434_s1 + $0x20] sm:$0xff] }
   0xa   :  { %869 = vmatmul.mubr.msk.f32.gmra.mrb[2].mxu0 %vm82_vm1, %v1128_v8  ;;  %v36_v15 = vld [vmem:[%s1435_s2 + $0x38] sm:$0xff]  ;;  %v1175_v17 = vld [vmem:[%s1434_s1 + $0x28] sm:$0xff]  ;;  %v1183_v18 = vld [vmem:[%s1434_s1 + $0x30] sm:$0xff] }
   0xb   :  { %188 = vmatprep.mubr.f32.mxu0 %v1058_v2  ;;  %v1191_v19 = vld [vmem:[%s1434_s1 + $0x38] sm:$0xff] }
   0xc   :  { %62 = vperm.xlu0 %926, %v33_v10   ;;  %67 = vperm.xlu1 %927, %v34_v12  }
   0xe   :  { %870 = vmatmul.mubr.msk.f32.gmra.mrb[4].mxu0 %vm82_vm1, %v1142_v11 }
   0xf   :  { %194 = vmatprep.mubr.f32.mxu0 %v1058_v2 }
  0x10   :  { %72 = vperm.xlu0 %926, %v35_v13   ;;  %77 = vperm.xlu1 %927, %v36_v15  }
  0x12   :  { %871 = vmatmul.mubr.msk.f32.gmra.mrb[6].mxu0 %vm82_vm1, %v1156_v14 }
  0x13   :  { %200 = vmatprep.mubr.f32.mxu0 %v1058_v2 }
  0x16   :  { %872 = vmatmul.mubr.msk.f32.gmra.mrb[8].mxu0 %vm82_vm1, %v1167_v16 }
  0x17   :  { %206 = vmatprep.mubr.f32.mxu0 %v1058_v2 }
  0x1a   :  { %873 = vmatmul.mubr.msk.f32.gmra.mrb[10].mxu0 %vm82_vm1, %v1175_v17 }
  0x1b   :  { %212 = vmatprep.mubr.f32.mxu0 %v1058_v2 }
  0x1e   :  { %874 = vmatmul.mubr.msk.f32.gmra.mrb[12].mxu0 %vm82_vm1, %v1183_v18 }
  0x1f   :  { %218 = vmatprep.mubr.f32.mxu0 %v1058_v2 }
  0x22   :  { %875 = vmatmul.mubr.msk.f32.gmra.mrb[14].mxu0 %vm82_vm1, %v1191_v19 }
  0x23   :  { %832 = vmatprep.mubr.f32.mxu0 %v1058_v2 }
  0x82   :  { %v1203_v30 = vpop.permute.xlu1 %52 }
  0x83   :  { %v1196_v20 = vpop.permute.xlu0 %42 }
  0x87   :  { %v1200_v25 = vpop.permute.xlu0 %47  ;;  %v1208_v37 = vpop.permute.xlu1 %57 }
  0x8b   :  { %v1212_v43 = vpop.permute.xlu0 %62  ;;  %v1216_v49 = vpop.permute.xlu1 %67 }
  0x8f   :  { %v1224_v55 = vpop.permute.xlu0 %72  ;;  %v1234_v61 = vpop.permute.xlu1 %77 }
  0xd9   :  { %v178_v21 = vpop.f32.mrb[0].mxu0 }
  0xda   :  { %v179_v22 = vadd.f32 %v178_v21, %v1196_v20  ;;  %v180_v23 = vpop.f32.mrb[1].mxu0 }
  0xdb   :  { %v181_v24 = vadd.f32 %v180_v23, %v1196_v20 }
  0xdd   :  { %v184_v26 = vpop.f32.mrb[2].mxu0  ;;  %v225_v27 = vmax.f32 %v179_v22, %v181_v24 }
  0xde   :  { %v185_v28 = vadd.f32 %v184_v26, %v1200_v25  ;;  %v186_v29 = vpop.f32.mrb[3].mxu0 }
  0xdf   :  { %v187_v31 = vadd.f32 %v186_v29, %v1200_v25  ;;  %226 = vmax.xlane.f32.xlu0 %v225_v27 }
  0xe1   :  { %v190_v32 = vpop.f32.mrb[4].mxu0  ;;  %v228_v33 = vmax.f32 %v185_v28, %v187_v31 }
  0xe2   :  { %v191_v34 = vadd.f32 %v190_v32, %v1203_v30  ;;  %v192_v35 = vpop.f32.mrb[5].mxu0 }
  0xe3   :  { %v193_v36 = vadd.f32 %v192_v35, %v1203_v30  ;;  %229 = vmax.xlane.f32.xlu1 %v228_v33 }
  0xe5   :  { %v196_v38 = vpop.f32.mrb[6].mxu0  ;;  %v231_v39 = vmax.f32 %v191_v34, %v193_v36 }
  0xe6   :  { %v197_v40 = vadd.f32 %v196_v38, %v1208_v37  ;;  %v198_v41 = vpop.f32.mrb[7].mxu0 }
  0xe7   :  { %v199_v42 = vadd.f32 %v198_v41, %v1208_v37  ;;  %232 = vmax.xlane.f32.xlu0 %v231_v39 }
  0xe9   :  { %v202_v44 = vpop.f32.mrb[8].mxu0  ;;  %v234_v45 = vmax.f32 %v197_v40, %v199_v42 }
  0xea   :  { %v203_v46 = vadd.f32 %v202_v44, %v1212_v43  ;;  %v204_v47 = vpop.f32.mrb[9].mxu0 }
  0xeb   :  { %v205_v48 = vadd.f32 %v204_v47, %v1212_v43  ;;  %235 = vmax.xlane.f32.xlu0 %v234_v45 }
  0xed   :  { %v208_v50 = vpop.f32.mrb[10].mxu0  ;;  %v237_v51 = vmax.f32 %v203_v46, %v205_v48 }
  0xee   :  { %v1219_v52 = vadd.f32 %v208_v50, %v1216_v49  ;;  %v210_v53 = vpop.f32.mrb[11].mxu0 }
  0xef   :  { %v1222_v54 = vadd.f32 %v210_v53, %v1216_v49  ;;  %238 = vmax.xlane.f32.xlu1 %v237_v51 }
  0xf1   :  { %v214_v56 = vpop.f32.mrb[12].mxu0  ;;  %v240_v57 = vmax.f32 %v1219_v52, %v1222_v54 }
  0xf2   :  { %v1229_v58 = vadd.f32 %v214_v56, %v1224_v55  ;;  %v216_v59 = vpop.f32.mrb[13].mxu0 }
  0xf3   :  { %v1232_v60 = vadd.f32 %v216_v59, %v1224_v55  ;;  %241 = vmax.xlane.f32.xlu0 %v240_v57 }
  0xf5   :  { %v220_v62 = vpop.f32.mrb[14].mxu0  ;;  %v243_v63 = vmax.f32 %v1229_v58, %v1232_v60 }
  0xf6   :  { %v1239_v4 = vadd.f32 %v220_v62, %v1234_v61  ;;  %v222_v5 = vpop.f32.mrb[15].mxu0 }
  0xf7   :  { %v1242_v6 = vadd.f32 %v222_v5, %v1234_v61  ;;  %244 = vmax.xlane.f32.xlu1 %v243_v63 }
  0xf9   :  { %v246_v7 = vmax.f32 %v1239_v4, %v1242_v6 }
  0xfb   :  { %247 = vmax.xlane.f32.xlu0 %v246_v7 }
 0x16c   :  { %v227_v9 = vpop.xlane.xlu0 %226 }
 0x16d   :  { %v249_v10 = vsub.f32 %v179_v22, %v227_v9  ;;  %v250_v12 = vsub.f32 %v181_v24, %v227_v9 }
 0x16f   :  { %v265_v13 = vmul.f32 1.442695, %v249_v10  ;;  %v267_v15 = vmul.f32 1.442695, %v250_v12 }
 0x170   :  { %v230_v21 = vpop.xlane.xlu1 %229 }
 0x171   :  { %930 = vpow2.f32 %v265_v13  ;;  %v251_v23 = vsub.f32 %v185_v28, %v230_v21  ;;  %v252_v26 = vsub.f32 %v187_v31, %v230_v21 }
 0x172   :  { %932 = vpow2.f32 %v267_v15 }
 0x173   :  { %v269_v27 = vmul.f32 1.442695, %v251_v23  ;;  %v271_v29 = vmul.f32 1.442695, %v252_v26 }
 0x174   :  { %v233_v32 = vpop.xlane.xlu0 %232 }
 0x175   :  { %934 = vpow2.f32 %v269_v27  ;;  %v253_v33 = vsub.f32 %v191_v34, %v233_v32  ;;  %v254_v35 = vsub.f32 %v193_v36, %v233_v32 }
 0x176   :  { %936 = vpow2.f32 %v271_v29 }
 0x177   :  { %v273_v38 = vmul.f32 1.442695, %v253_v33  ;;  %v275_v39 = vmul.f32 1.442695, %v254_v35 }
 0x178   :  { %v236_v41 = vpop.xlane.xlu0 %235 }
 0x179   :  { %938 = vpow2.f32 %v273_v38  ;;  %v255_v22 = vsub.f32 %v197_v40, %v236_v41  ;;  %v256_v24 = vsub.f32 %v199_v42, %v236_v41 }
 0x17a   :  { %940 = vpow2.f32 %v275_v39 }
 0x17b   :  { %v1246_v44 = vpop.eup %930  ;;  %v277_v45 = vmul.f32 1.442695, %v255_v22  ;;  %v279_v28 = vmul.f32 1.442695, %v256_v24 }
 0x17c   :  { %v1248_v31 = vpop.eup %932  ;;  %v239_v47 = vpop.xlane.xlu1 %238 }
 0x17d   :  { %942 = vpow2.f32 %v277_v45  ;;  %v257_v50 = vsub.f32 %v203_v46, %v239_v47  ;;  %v258_v51 = vsub.f32 %v205_v48, %v239_v47  ;;  %v297_v34 = vadd.f32 %v1248_v31, %v1246_v44 }
 0x17e   :  { %944 = vpow2.f32 %v279_v28 }
 0x17f   :  { %v1252_v36 = vpop.eup %934  ;;  %v281_v53 = vmul.f32 1.442695, %v257_v50  ;;  %v283_v40 = vmul.f32 1.442695, %v258_v51  ;;  %298 = vadd.xlane.f32.xlu1 %v297_v34 }
 0x180   :  { %v1254_v42 = vpop.eup %936  ;;  %v242_v56 = vpop.xlane.xlu0 %241 }
 0x181   :  { %946 = vpow2.f32 %v281_v53  ;;  %v259_v57 = vsub.f32 %v1219_v52, %v242_v56  ;;  %v260_v59 = vsub.f32 %v1222_v54, %v242_v56  ;;  %v300_v46 = vadd.f32 %v1254_v42, %v1252_v36 }
 0x182   :  { %948 = vpow2.f32 %v283_v40 }
 0x183   :  { %v1260_v48 = vpop.eup %938  ;;  %v285_v62 = vmul.f32 1.442695, %v259_v57  ;;  %v287_v63 = vmul.f32 1.442695, %v260_v59  ;;  %301 = vadd.xlane.f32.xlu0 %v300_v46 }
 0x184   :  { %v941_v5 = vpop.eup %940  ;;  %v245_v7 = vpop.xlane.xlu1 %244 }
 0x185   :  { %950 = vpow2.f32 %v285_v62  ;;  %v261_v9 = vsub.f32 %v1229_v58, %v245_v7  ;;  %v262_v10 = vsub.f32 %v1232_v60, %v245_v7  ;;  %v303_v52 = vadd.f32 %v941_v5, %v1260_v48 }
 0x186   :  { %952 = vpow2.f32 %v287_v63 }
 0x187   :  { %v943_v54 = vpop.eup %942  ;;  %v289_v12 = vmul.f32 1.442695, %v261_v9  ;;  %v291_v13 = vmul.f32 1.442695, %v262_v10  ;;  %304 = vadd.xlane.f32.xlu1 %v303_v52 }
 0x188   :  { %v945_v15 = vpop.eup %944  ;;  %v248_v21 = vpop.xlane.xlu0 %247 }
 0x189   :  { %954 = vpow2.f32 %v289_v12  ;;  %v263_v23 = vsub.f32 %v1239_v4, %v248_v21  ;;  %v264_v26 = vsub.f32 %v1242_v6, %v248_v21  ;;  %v306_v27 = vadd.f32 %v945_v15, %v943_v54 }
 0x18a   :  { %956 = vpow2.f32 %v291_v13 }
 0x18b   :  { %v947_v29 = vpop.eup %946  ;;  %v293_v58 = vmul.f32 1.442695, %v263_v23  ;;  %v295_v32 = vmul.f32 1.442695, %v264_v26  ;;  %307 = vadd.xlane.f32.xlu0 %v306_v27 }
 0x18c   :  { %v949_v60 = vpop.eup %948 }
 0x18d   :  { %958 = vpow2.f32 %v293_v58  ;;  %v309_v33 = vadd.f32 %v949_v60, %v947_v29 }
 0x18e   :  { %960 = vpow2.f32 %v295_v32 }
 0x18f   :  { %v951_v35 = vpop.eup %950  ;;  %310 = vadd.xlane.f32.xlu1 %v309_v33 }
 0x190   :  { %v953_v38 = vpop.eup %952 }
 0x191   :  { %v312_v39 = vadd.f32 %v953_v38, %v951_v35 }
 0x193   :  { %v955_v41 = vpop.eup %954  ;;  %313 = vadd.xlane.f32.xlu0 %v312_v39 }
 0x194   :  { %v957_v22 = vpop.eup %956 }
 0x195   :  { %v315_v4 = vadd.f32 %v957_v22, %v955_v41 }
 0x197   :  { %v959_v24 = vpop.eup %958  ;;  %316 = vadd.xlane.f32.xlu1 %v315_v4 }
 0x198   :  { %v961_v6 = vpop.eup %960 }
 0x199   :  { %v318_v45 = vadd.f32 %v961_v6, %v959_v24 }
 0x19b   :  { %319 = vadd.xlane.f32.xlu0 %v318_v45 }
 0x20c   :  { %v299_v28 = vpop.xlane.xlu1 %298 }
 0x210   :  { %v302_v47 = vpop.xlane.xlu0 %301 }
 0x211   :  { %962 = vrcp.f32 %v302_v47 }
 0x212   :  { %964 = vrcp.f32 %v299_v28 }
 0x214   :  { %v305_v50 = vpop.xlane.xlu1 %304 }
 0x215   :  { %966 = vrcp.f32 %v305_v50 }
 0x218   :  { %v308_v51 = vpop.xlane.xlu0 %307 }
 0x219   :  { %968 = vrcp.f32 %v308_v51 }
 0x21b   :  { %v963_v40 = vpop.eup %962 }
 0x21c   :  { %v311_v34 = vpop.xlane.xlu1 %310  ;;  %v965_v56 = vpop.eup %964  ;;  %v332_v46 = vmul.f32 %v963_v40, %v1254_v42  ;;  %v331_v62 = vmul.f32 %v963_v40, %v1252_v36 }
 0x21d   :  { %970 = vrcp.f32 %v311_v34  ;;  %v330_v9 = vmul.f32 %v965_v56, %v1248_v31  ;;  %v329_v52 = vmul.f32 %v965_v56, %v1246_v44 }
 0x21f   :  { %v967_v59 = vpop.eup %966  ;;  %v358_v26 = vadd.f32 %v332_v46, %v330_v9  ;;  %v345_v27 = vadd.f32 %v331_v62, %v329_v52 }
 0x220   :  { %v314_v53 = vpop.xlane.xlu0 %313  ;;  %v334_v10 = vmul.f32 %v967_v59, %v941_v5  ;;  %v333_v12 = vmul.f32 %v967_v59, %v1260_v48 }
 0x221   :  { %972 = vrcp.f32 %v314_v53 }
 0x222   :  { %v359_v33 = vadd.f32 %v358_v26, %v334_v10  ;;  %v346_v36 = vadd.f32 %v345_v27, %v333_v12 }
 0x223   :  { %v969_v63 = vpop.eup %968 }
 0x224   :  { %v317_v57 = vpop.xlane.xlu1 %316  ;;  %v335_v21 = vmul.f32 %v969_v63, %v943_v54  ;;  %v336_v23 = vmul.f32 %v969_v63, %v945_v15 }
 0x225   :  { %974 = vrcp.f32 %v317_v57 }
 0x226   :  { %v360_v45 = vadd.f32 %v359_v33, %v336_v23  ;;  %v347_v31 = vadd.f32 %v346_v36, %v335_v21 }
 0x227   :  { %v971_v13 = vpop.eup %970 }
 0x228   :  { %v320_v7 = vpop.xlane.xlu0 %319  ;;  %v337_v32 = vmul.f32 %v971_v13, %v947_v29  ;;  %v338_v42 = vmul.f32 %v971_v13, %v949_v60 }
 0x229   :  { %976 = vrcp.f32 %v320_v7 }
 0x22a   :  { %v361_v47 = vadd.f32 %v360_v45, %v338_v42  ;;  %v348_v48 = vadd.f32 %v347_v31, %v337_v32 }
 0x22b   :  { %v973_v58 = vpop.eup %972 }
 0x22c   :  { %v339_v39 = vmul.f32 %v973_v58, %v951_v35  ;;  %v340_v4 = vmul.f32 %v973_v58, %v953_v38 }
 0x22e   :  { %v362_v50 = vadd.f32 %v361_v47, %v340_v4  ;;  %v349_v51 = vadd.f32 %v348_v48, %v339_v39 }
 0x22f   :  { %v975_v5 = vpop.eup %974 }
 0x230   :  { %v341_v28 = vmul.f32 %v975_v5, %v955_v41  ;;  %v342_v44 = vmul.f32 %v975_v5, %v957_v22 }
 0x232   :  { %v363_v53 = vadd.f32 %v362_v50, %v342_v44  ;;  %v350_v40 = vadd.f32 %v349_v51, %v341_v28 }
 0x233   :  { %v977_v54 = vpop.eup %976 }
 0x234   :  { %v343_v15 = vmul.f32 %v977_v54, %v959_v24  ;;  %v344_v34 = vmul.f32 %v977_v54, %v961_v6 }
 0x236   :  { %v364_v29 = vadd.f32 %v363_v53, %v344_v34  ;;  %v351_v60 = vadd.f32 %v350_v40, %v343_v15 }
 0x238   :  { %v365_v56 = vrot.slane %v364_v29, 4  ;;  %v352_v57 = vrot.slane %v351_v60, 4 }
 0x23a   :  { %v366_v35 = vadd.f32 %v365_v56, %v364_v29  ;;  %v353_v38 = vadd.f32 %v352_v57, %v351_v60 }
 0x23c   :  { %v367_v59 = vrot.slane %v366_v35, 2  ;;  %v354_v63 = vrot.slane %v353_v38, 2 }
 0x23e   :  { %v368_v7 = vadd.f32 %v367_v59, %v366_v35  ;;  %v355_v41 = vadd.f32 %v354_v63, %v353_v38 }
 0x240   :  { %v369_v22 = vrot.slane %v368_v7, 1  ;;  %v356_v13 = vrot.slane %v355_v41, 1 }
 0x242   :  { %v370_v26 = vadd.f32 %v369_v22, %v368_v7  ;;  %v357_v27 = vadd.f32 %v356_v13, %v355_v41 }
 0x244   :  { %v372_v58 = vadd.f32 1e-09, %v370_v26  ;;  %v371_v33 = vadd.f32 1e-09, %v357_v27 }
 0x246   :  { %978 = vrcp.f32 %v372_v58 }
 0x247   :  { %980 = vrcp.f32 %v371_v33 }
 0x250   :  { %v979_v24 = vpop.eup %978 }
 0x251   :  { %v981_v6 = vpop.eup %980  ;;  %v376_v36 = vmul.f32 %v979_v24, %v330_v9  ;;  %v378_v45 = vmul.f32 %v979_v24, %v332_v46  ;;  %v380_v31 = vmul.f32 %v979_v24, %v334_v10  ;;  %v382_v5 = vmul.f32 %v979_v24, %v336_v23 }
 0x252   :  { %v375_v47 = vmul.f32 %v981_v6, %v329_v52  ;;  %v377_v48 = vmul.f32 %v981_v6, %v331_v62  ;;  %v379_v54 = vmul.f32 %v981_v6, %v333_v12  ;;  %v381_v53 = vmul.f32 %v981_v6, %v335_v21  ;;  %v1275_v12 = vld [vmem:[%s1433_s0 + $0x8] sm:$0xff] }
 0x253   :  { %v889_v50 = vpack.c.bf16 %v378_v45, %v376_v36  ;;  %v893_v40 = vpack.c.bf16 %v382_v5, %v380_v31  ;;  %v384_v29 = vmul.f32 %v979_v24, %v338_v42  ;;  %v386_v60 = vmul.f32 %v979_v24, %v340_v4  ;;  %v1284_v42 = vld [vmem:[%s1436_s3] sm:$0xf] }
 0x254   :  { %v891_v51 = vpack.c.bf16 %v377_v48, %v375_v47  ;;  %v895_v56 = vpack.c.bf16 %v381_v53, %v379_v54  ;;  %v383_v57 = vmul.f32 %v981_v6, %v337_v32  ;;  %v385_v35 = vmul.f32 %v981_v6, %v339_v39 }
 0x255   :  { %890 = vmatprep.subr.bf16.mxu1 %v889_v50  ;;  %v897_v38 = vpack.c.bf16 %v386_v60, %v384_v29  ;;  %v388_v9 = vmul.f32 %v979_v24, %v342_v44  ;;  %v390_v46 = vmul.f32 %v979_v24, %v344_v34  ;;  %v387_v62 = vmul.f32 %v981_v6, %v341_v28 }
 0x256   :  { %892 = vmatpush1.bf16.msra.mxu1 %v891_v51  ;;  %v899_v10 = vpack.c.bf16 %v385_v35, %v383_v57  ;;  %v389_v52 = vmul.f32 %v981_v6, %v343_v15  ;;  %v1279_v23 = vcombine.high %v1275_v12, %v1275_v12 }
 0x257   :  { %894 = vmatprep.subr.bf16.mxu1 %v893_v40  ;;  %v901_v21 = vpack.c.bf16 %v390_v46, %v388_v9 }
 0x258   :  { %v903_v32 = vpack.c.bf16 %v389_v52, %v387_v62 }
 0x25a   :  { %896 = vmatpush1.bf16.msra.mxu1 %v895_v56 }
 0x25b   :  { %898 = vmatprep.subr.bf16.mxu1 %v897_v38 }
 0x25e   :  { %900 = vmatpush1.bf16.msra.mxu1 %v899_v10 }
 0x25f   :  { %902 = vmatprep.subr.bf16.mxu1 %v901_v21 }
 0x262   :  { %904 = vmatpush1.bf16.msra.mxu1 %v903_v32 }
 0x263   :  { %878 = vmatprep.subr.msk.mxu1 %vm107_vm0, %v1279_v23 }
 0x265   :  { %876 = vmatmul.mubr.msk.f32.vlgmr.msra.gmra.mrb[0].mxu1 %vm396_vm2, %v1284_v42 }
 0x266   :  { %879 = vmatpush1.msk.msra.mxu1 %vm107_vm0, %v1275_v12  ;;  %553 = vmatprep.mubr.f32.mxu1 %v1058_v2 }
 0x269   :  { %880 = vmatmul.mubr.msk.f32.vlgmr.msra.gmra.mrb[2].mxu1 %vm82_vm1, %v1107_v3 }
 0x26a   :  { %559 = vmatprep.mubr.f32.mxu1 %v1058_v2 }
 0x26d   :  { %881 = vmatmul.mubr.msk.f32.gmra.mrb[4].mxu1 %vm82_vm1, %v1128_v8 }
 0x26e   :  { %565 = vmatprep.mubr.f32.mxu1 %v1058_v2 }
 0x271   :  { %882 = vmatmul.mubr.msk.f32.gmra.mrb[6].mxu1 %vm82_vm1, %v1142_v11 }
 0x272   :  { %571 = vmatprep.mubr.f32.mxu1 %v1058_v2 }
 0x275   :  { %883 = vmatmul.mubr.msk.f32.gmra.mrb[8].mxu1 %vm82_vm1, %v1156_v14 }
 0x276   :  { %577 = vmatprep.mubr.f32.mxu1 %v1058_v2 }
 0x279   :  { %884 = vmatmul.mubr.msk.f32.gmra.mrb[10].mxu1 %vm82_vm1, %v1167_v16 }
 0x27a   :  { %583 = vmatprep.mubr.f32.mxu1 %v1058_v2 }
 0x27d   :  { %885 = vmatmul.mubr.msk.f32.gmra.mrb[12].mxu1 %vm82_vm1, %v1175_v17 }
 0x27e   :  { %589 = vmatprep.mubr.f32.mxu1 %v1058_v2 }
 0x281   :  { %886 = vmatmul.mubr.msk.f32.gmra.mrb[14].mxu1 %vm82_vm1, %v1183_v18 }
 0x282   :  { %595 = vmatprep.mubr.f32.mxu1 %v1058_v2 }
 0x285   :  { %887 = vmatmul.mubr.msk.f32.gmra.mrb[16].mxu1 %vm82_vm1, %v1191_v19 }
 0x338   :  { %v1316_v3 = vpop.f32.mrb[0].mxu1 }
 0x339   :  { %v1318_v8 = vpop.f32.mrb[1].mxu1 }
 0x33c   :  { %v555_v11 = vpop.f32.mrb[2].mxu1 }
 0x33d   :  { %v556_v14 = vadd.f32 %v555_v11, %v1196_v20  ;;  %v557_v16 = vpop.f32.mrb[3].mxu1 }
 0x33e   :  { %v558_v17 = vadd.f32 %v557_v16, %v1196_v20 }
 0x340   :  { %v561_v39 = vpop.f32.mrb[4].mxu1  ;;  %v602_v4 = vmax.f32 %v556_v14, %v558_v17 }
 0x341   :  { %v562_v28 = vadd.f32 %v561_v39, %v1200_v25  ;;  %v563_v18 = vpop.f32.mrb[5].mxu1 }
 0x342   :  { %v564_v2 = vadd.f32 %v563_v18, %v1200_v25  ;;  %603 = vmax.xlane.f32.xlu1 %v602_v4 }
 0x344   :  { %v567_v44 = vpop.f32.mrb[6].mxu1  ;;  %v605_v19 = vmax.f32 %v562_v28, %v564_v2 }
 0x345   :  { %v568_v15 = vadd.f32 %v567_v44, %v1203_v30  ;;  %v569_v34 = vpop.f32.mrb[7].mxu1 }
 0x346   :  { %v570_v59 = vadd.f32 %v569_v34, %v1203_v30  ;;  %606 = vmax.xlane.f32.xlu0 %v605_v19 }
 0x348   :  { %v573_v63 = vpop.f32.mrb[8].mxu1  ;;  %v608_v7 = vmax.f32 %v568_v15, %v570_v59 }
 0x349   :  { %v574_v20 = vadd.f32 %v573_v63, %v1208_v37  ;;  %v575_v41 = vpop.f32.mrb[9].mxu1 }
 0x34a   :  { %v576_v22 = vadd.f32 %v575_v41, %v1208_v37  ;;  %609 = vmax.xlane.f32.xlu1 %v608_v7 }
 0x34c   :  { %v579_v13 = vpop.f32.mrb[10].mxu1  ;;  %v611_v26 = vmax.f32 %v574_v20, %v576_v22 }
 0x34d   :  { %v580_v25 = vadd.f32 %v579_v13, %v1212_v43  ;;  %v581_v27 = vpop.f32.mrb[11].mxu1 }
 0x34e   :  { %v582_v58 = vadd.f32 %v581_v27, %v1212_v43  ;;  %612 = vmax.xlane.f32.xlu0 %v611_v26 }
 0x350   :  { %v585_v33 = vpop.f32.mrb[12].mxu1  ;;  %v614_v24 = vmax.f32 %v580_v25, %v582_v58 }
 0x351   :  { %v1331_v30 = vadd.f32 %v585_v33, %v1216_v49  ;;  %v587_v6 = vpop.f32.mrb[13].mxu1 }
 0x352   :  { %v1334_v36 = vadd.f32 %v587_v6, %v1216_v49  ;;  %615 = vmax.xlane.f32.xlu1 %v614_v24 }
 0x354   :  { %v591_v37 = vpop.f32.mrb[14].mxu1  ;;  %v617_v45 = vmax.f32 %v1331_v30, %v1334_v36 }
 0x355   :  { %v1339_v31 = vadd.f32 %v591_v37, %v1224_v55  ;;  %v593_v5 = vpop.f32.mrb[15].mxu1 }
 0x356   :  { %v1342_v43 = vadd.f32 %v593_v5, %v1224_v55  ;;  %618 = vmax.xlane.f32.xlu0 %v617_v45 }
 0x358   :  { %v597_v47 = vpop.f32.mrb[16].mxu1  ;;  %v620_v48 = vmax.f32 %v1339_v31, %v1342_v43 }
 0x359   :  { %v1347_v49 = vadd.f32 %v597_v47, %v1234_v61  ;;  %v599_v50 = vpop.f32.mrb[17].mxu1 }
 0x35a   :  { %v1350_v51 = vadd.f32 %v599_v50, %v1234_v61  ;;  %621 = vmax.xlane.f32.xlu1 %v620_v48 }
 0x35c   :  { %v623_v54 = vmax.f32 %v1347_v49, %v1350_v51 }
 0x35e   :  { %624 = vmax.xlane.f32.xlu0 %v623_v54 }
 0x3cf   :  { %v604_v53 = vpop.xlane.xlu1 %603 }
 0x3d0   :  { %v626_v55 = vsub.f32 %v556_v14, %v604_v53  ;;  %v627_v40 = vsub.f32 %v558_v17, %v604_v53 }
 0x3d2   :  { %v642_v29 = vmul.f32 1.442695, %v626_v55  ;;  %v644_v60 = vmul.f32 1.442695, %v627_v40 }
 0x3d3   :  { %v607_v56 = vpop.xlane.xlu0 %606 }
 0x3d4   :  { %982 = vpow2.f32 %v642_v29  ;;  %v628_v57 = vsub.f32 %v562_v28, %v607_v56  ;;  %v629_v35 = vsub.f32 %v564_v2, %v607_v56 }
 0x3d5   :  { %984 = vpow2.f32 %v644_v60 }
 0x3d6   :  { %v646_v38 = vmul.f32 1.442695, %v628_v57  ;;  %v648_v9 = vmul.f32 1.442695, %v629_v35  ;;  %v38_v35 = vld [vmem:[%s1437_s4] sm:$0xf] }
 0x3d7   :  { %v610_v46 = vpop.xlane.xlu1 %609  ;;  %s1060_s4 = smov [#allocation2]  }
 0x3d8   :  { %986 = vpow2.f32 %v646_v38  ;;  %v630_v61 = vsub.f32 %v568_v15, %v610_v46  ;;  %v631_v10 = vsub.f32 %v570_v59, %v610_v46  ;;  %s855_s29 = sshll.u32 %s1060_s4, 4  ;;  %s856_s29 = int_to_ptr.vmem [resolvable:$true] %s855_s29 }
 0x3d9   :  { %988 = vpow2.f32 %v648_v9  ;;  %s1034_s30 = scalar_lea.vmem %s856_s29, 256  ;;  %p1039_p1 = scmp.lt.s32.totalorder %s856_s29, %s856_s29 }
 0x3da   :  { %v650_v62 = vmul.f32 1.442695, %v630_v61  ;;  %v652_v52 = vmul.f32 1.442695, %v631_v10  ;;  %p1035_p0 = scmp.ne.s32.totalorder %s856_s29, %s1034_s30  ;;  %p1040_p2 = scmp.lt.s32.totalorder %s1034_s30, %s1034_s30 }
 0x3db   :  { %v613_v21 = vpop.xlane.xlu0 %612 }
 0x3dc   :  { %990 = vpow2.f32 %v650_v62  ;;  %v632_v32 = vsub.f32 %v574_v20, %v613_v21  ;;  %v633_v11 = vsub.f32 %v576_v22, %v613_v21  ;;  %p1041_p3 = por %p1040_p2, %p1039_p1 }
 0x3dd   :  { %992 = vpow2.f32 %v652_v52 }
 0x3de   :  { %v1354_v14 = vpop.eup %982  ;;  %v654_v16 = vmul.f32 1.442695, %v632_v32  ;;  %v656_v17 = vmul.f32 1.442695, %v633_v11  ;;  %p1042_p4 = pnand %p1041_p3, %p1035_p0 }
 0x3df   :  { %v1356_v39 = vpop.eup %984  ;;  %v616_v4 = vpop.xlane.xlu1 %615 }
 0x3e0   :  { %994 = vpow2.f32 %v654_v16  ;;  %v634_v28 = vsub.f32 %v580_v25, %v616_v4  ;;  %v635_v18 = vsub.f32 %v582_v58, %v616_v4  ;;  %v674_v2 = vadd.f32 %v1356_v39, %v1354_v14 }
 0x3e1   :  { %996 = vpow2.f32 %v656_v17 }
 0x3e2   :  { %v1360_v44 = vpop.eup %986  ;;  %v658_v19 = vmul.f32 1.442695, %v634_v28  ;;  %v660_v15 = vmul.f32 1.442695, %v635_v18  ;;  %675 = vadd.xlane.f32.xlu1 %v674_v2 }
 0x3e3   :  { %v1362_v34 = vpop.eup %988  ;;  %v619_v59 = vpop.xlane.xlu0 %618 }
 0x3e4   :  { %998 = vpow2.f32 %v658_v19  ;;  %v636_v63 = vsub.f32 %v1331_v30, %v619_v59  ;;  %v637_v7 = vsub.f32 %v1334_v36, %v619_v59  ;;  %v677_v20 = vadd.f32 %v1362_v34, %v1360_v44 }
 0x3e5   :  { %1000 = vpow2.f32 %v660_v15 }
 0x3e6   :  { %v1368_v41 = vpop.eup %990  ;;  %v662_v22 = vmul.f32 1.442695, %v636_v63  ;;  %v664_v13 = vmul.f32 1.442695, %v637_v7  ;;  %678 = vadd.xlane.f32.xlu0 %v677_v20 }
 0x3e7   :  { %v993_v26 = vpop.eup %992  ;;  %v622_v25 = vpop.xlane.xlu1 %621 }
 0x3e8   :  { %1002 = vpow2.f32 %v662_v22  ;;  %v638_v27 = vsub.f32 %v1339_v31, %v622_v25  ;;  %v639_v58 = vsub.f32 %v1342_v43, %v622_v25  ;;  %v680_v33 = vadd.f32 %v993_v26, %v1368_v41 }
 0x3e9   :  { %1004 = vpow2.f32 %v664_v13 }
 0x3ea   :  { %v1373_v24 = vpop.eup %994  ;;  %v666_v30 = vmul.f32 1.442695, %v638_v27  ;;  %v668_v6 = vmul.f32 1.442695, %v639_v58  ;;  %681 = vadd.xlane.f32.xlu1 %v680_v33 }
 0x3eb   :  { %v997_v36 = vpop.eup %996  ;;  %v625_v37 = vpop.xlane.xlu0 %624 }
 0x3ec   :  { %1006 = vpow2.f32 %v666_v30  ;;  %v640_v45 = vsub.f32 %v1347_v49, %v625_v37  ;;  %v641_v5 = vsub.f32 %v1350_v51, %v625_v37  ;;  %v683_v47 = vadd.f32 %v997_v36, %v1373_v24 }
 0x3ed   :  { %1008 = vpow2.f32 %v668_v6 }
 0x3ee   :  { %v999_v31 = vpop.eup %998  ;;  %v670_v43 = vmul.f32 1.442695, %v640_v45  ;;  %v672_v48 = vmul.f32 1.442695, %v641_v5  ;;  %684 = vadd.xlane.f32.xlu0 %v683_v47 }
 0x3ef   :  { %v1001_v50 = vpop.eup %1000 }
 0x3f0   :  { %1010 = vpow2.f32 %v670_v43  ;;  %v686_v54 = vadd.f32 %v1001_v50, %v999_v31 }
 0x3f1   :  { %1012 = vpow2.f32 %v672_v48 }
 0x3f2   :  { %v1003_v53 = vpop.eup %1002  ;;  %687 = vadd.xlane.f32.xlu1 %v686_v54 }
 0x3f3   :  { %v1005_v55 = vpop.eup %1004 }
 0x3f4   :  { %v689_v40 = vadd.f32 %v1005_v55, %v1003_v53 }
 0x3f6   :  { %v1007_v29 = vpop.eup %1006  ;;  %690 = vadd.xlane.f32.xlu0 %v689_v40 }
 0x3f7   :  { %v1009_v49 = vpop.eup %1008 }
 0x3f8   :  { %v692_v60 = vadd.f32 %v1009_v49, %v1007_v29 }
 0x3fa   :  { %v1378_v51 = vpop.eup %1010  ;;  %693 = vadd.xlane.f32.xlu1 %v692_v60 }
 0x3fb   :  { %v1380_v56 = vpop.eup %1012 }
 0x3fc   :  { %v695_v57 = vadd.f32 %v1380_v56, %v1378_v51 }
 0x3fe   :  { %696 = vadd.xlane.f32.xlu0 %v695_v57 }
 0x40b   :  { %393 = vperm.xlu1 %927, %v38_v35  }
 0x46f   :  { %v676_v38 = vpop.xlane.xlu1 %675 }
 0x473   :  { %v679_v9 = vpop.xlane.xlu0 %678 }
 0x474   :  { %1014 = vrcp.f32 %v679_v9 }
 0x475   :  { %1016 = vrcp.f32 %v676_v38 }
 0x477   :  { %v682_v46 = vpop.xlane.xlu1 %681 }
 0x478   :  { %1018 = vrcp.f32 %v682_v46 }
 0x47b   :  { %v685_v61 = vpop.xlane.xlu0 %684 }
 0x47c   :  { %1020 = vrcp.f32 %v685_v61 }
 0x47e   :  { %v1015_v52 = vpop.eup %1014 }
 0x47f   :  { %v688_v10 = vpop.xlane.xlu1 %687  ;;  %v1017_v21 = vpop.eup %1016  ;;  %v1388_v16 = vmul.f32 %v1015_v52, %v1362_v34  ;;  %v1391_v17 = vmul.f32 %v1015_v52, %v1360_v44 }
 0x480   :  { %1022 = vrcp.f32 %v688_v10  ;;  %v707_v15 = vmul.f32 %v1017_v21, %v1356_v39  ;;  %v706_v59 = vmul.f32 %v1017_v21, %v1354_v14 }
 0x482   :  { %v1019_v11 = vpop.eup %1018  ;;  %v722_v22 = vadd.f32 %v1391_v17, %v706_v59 }
 0x483   :  { %v691_v62 = vpop.xlane.xlu0 %690  ;;  %v1394_v28 = vmul.f32 %v1019_v11, %v1368_v41  ;;  %v711_v18 = vmul.f32 %v1019_v11, %v993_v26  ;;  %v735_v41 = vadd.f32 %v1388_v16, %v707_v15 }
 0x484   :  { %1024 = vrcp.f32 %v691_v62 }
 0x485   :  { %v736_v27 = vadd.f32 %v735_v41, %v711_v18 }
 0x486   :  { %v1021_v4 = vpop.eup %1020 }
 0x487   :  { %v694_v32 = vpop.xlane.xlu1 %693  ;;  %v712_v7 = vmul.f32 %v1021_v4, %v1373_v24  ;;  %v713_v20 = vmul.f32 %v1021_v4, %v997_v36 }
 0x488   :  { %1026 = vrcp.f32 %v694_v32 }
 0x489   :  { %v737_v24 = vadd.f32 %v736_v27, %v713_v20 }
 0x48a   :  { %v1023_v63 = vpop.eup %1022 }
 0x48b   :  { %v697_v2 = vpop.xlane.xlu0 %696  ;;  %v1396_v19 = vpop.permute.xlu1 %393  ;;  %v714_v26 = vmul.f32 %v1023_v63, %v999_v31  ;;  %v715_v25 = vmul.f32 %v1023_v63, %v1001_v50 }
 0x48c   :  { %1028 = vrcp.f32 %v697_v2  ;;  %v467_v34 = vadd.f32 %v1316_v3, %v1396_v19  ;;  %v469_v44 = vadd.f32 %v1318_v8, %v1396_v19  ;;  %v723_v3 = vadd.f32 %v722_v22, %v1394_v28 }
 0x48d   :  { %v738_v47 = vadd.f32 %v737_v24, %v715_v25 }
 0x48e   :  { %v1025_v13 = vpop.eup %1024  ;;  %v472_v39 = vadd.f32 %v467_v34, %v1096_v0  ;;  %v473_v14 = vadd.f32 %v469_v44, %v1100_v1  ;;  %v724_v6 = vadd.f32 %v723_v3, %v712_v7 }
 0x48f   :  { %v716_v8 = vmul.f32 %v1025_v13, %v1003_v53  ;;  %v717_v30 = vmul.f32 %v1025_v13, %v1005_v55 }
 0x490   :  { %v474_v58 = vmax.f32 %v472_v39, 0.0  ;;  %v475_v33 = vmax.f32 %v473_v14, 0.0  ;;  %v725_v43 = vadd.f32 %v724_v6, %v714_v26 }
 0x491   :  { %v739_v0 = vadd.f32 %v738_v47, %v717_v30 }
 0x492   :  { %v1027_v36 = vpop.eup %1026  ;;  %v478_v37 = vcombine.low %v474_v58, %v475_v33  ;;  %v726_v1 = vadd.f32 %v725_v43, %v716_v8 }
 0x493   :  { %v718_v45 = vmul.f32 %v1027_v36, %v1007_v29  ;;  %v719_v5 = vmul.f32 %v1027_v36, %v1009_v49 }
 0x494   :  { %480 = vst [vmem:[#allocation2] sm:$0xff] %v478_v37 }
 0x495   :  { %v740_v54 = vadd.f32 %v739_v0, %v719_v5  ;;  %v727_v40 = vadd.f32 %v726_v1, %v718_v45 }
 0x496   :  { %v1029_v31 = vpop.eup %1028 }
 0x497   :  { %v720_v48 = vmul.f32 %v1029_v31, %v1378_v51  ;;  %v721_v50 = vmul.f32 %v1029_v31, %v1380_v56 }
 0x499   :  { %v741_v53 = vadd.f32 %v740_v54, %v721_v50  ;;  %v728_v55 = vadd.f32 %v727_v40, %v720_v48 }
 0x49b   :  { %v742_v60 = vrot.slane %v741_v53, 4  ;;  %v729_v57 = vrot.slane %v728_v55, 4 }
 0x49d   :  { %v743_v35 = vadd.f32 %v742_v60, %v741_v53  ;;  %v730_v38 = vadd.f32 %v729_v57, %v728_v55 }
 0x49f   :  { %v744_v29 = vrot.slane %v743_v35, 2  ;;  %v731_v49 = vrot.slane %v730_v38, 2 }
 0x4a1   :  { %v745_v9 = vadd.f32 %v744_v29, %v743_v35  ;;  %v732_v46 = vadd.f32 %v731_v49, %v730_v38 }
 0x4a3   :  { %v746_v61 = vrot.slane %v745_v9, 1  ;;  %v733_v10 = vrot.slane %v732_v46, 1 }
 0x4a5   :  { %v747_v62 = vadd.f32 %v746_v61, %v745_v9  ;;  %v734_v52 = vadd.f32 %v733_v10, %v732_v46 }
 0x4a7   :  { %v749_v21 = vadd.f32 1e-09, %v747_v62  ;;  %v748_v51 = vadd.f32 1e-09, %v734_v52 }
 0x4a9   :  { %1030 = vrcp.f32 %v749_v21 }
 0x4aa   :  { %1032 = vrcp.f32 %v748_v51 }
 0x4b3   :  { %v1031_v56 = vpop.eup %1030 }
 0x4b4   :  { %v1033_v32 = vpop.eup %1032  ;;  %v753_v11 = vmul.f32 %v1031_v56, %v707_v15  ;;  %v755_v4 = vmul.f32 %v1031_v56, %v1388_v16  ;;  %v757_v2 = vmul.f32 %v1031_v56, %v711_v18  ;;  %v759_v63 = vmul.f32 %v1031_v56, %v713_v20 }
 0x4b5   :  { %v752_v34 = vmul.f32 %v1033_v32, %v706_v59  ;;  %v754_v44 = vmul.f32 %v1033_v32, %v1391_v17  ;;  %v756_v13 = vmul.f32 %v1033_v32, %v1394_v28  ;;  %v758_v39 = vmul.f32 %v1033_v32, %v712_v7 }
 0x4b6   :  { %v905_v41 = vpack.c.bf16 %v755_v4, %v753_v11  ;;  %v909_v14 = vpack.c.bf16 %v759_v63, %v757_v2  ;;  %v761_v27 = vmul.f32 %v1031_v56, %v715_v25  ;;  %v763_v3 = vmul.f32 %v1031_v56, %v717_v30 }
 0x4b7   :  { %v907_v22 = vpack.c.bf16 %v754_v44, %v752_v34  ;;  %v911_v58 = vpack.c.bf16 %v758_v39, %v756_v13  ;;  %v760_v15 = vmul.f32 %v1033_v32, %v714_v26  ;;  %v762_v33 = vmul.f32 %v1033_v32, %v716_v8 }
 0x4b8   :  { %906 = vmatprep.subr.bf16.mxu0 %v905_v41  ;;  %v913_v16 = vpack.c.bf16 %v763_v3, %v761_v27  ;;  %v765_v18 = vmul.f32 %v1031_v56, %v719_v5  ;;  %v767_v20 = vmul.f32 %v1031_v56, %v721_v50  ;;  %v764_v59 = vmul.f32 %v1033_v32, %v718_v45 }
 0x4b9   :  { %908 = vmatpush1.bf16.msra.mxu0 %v907_v22  ;;  %v915_v17 = vpack.c.bf16 %v762_v33, %v760_v15  ;;  %v766_v24 = vmul.f32 %v1033_v32, %v720_v48 }
 0x4ba   :  { %910 = vmatprep.subr.bf16.mxu0 %v909_v14  ;;  %v917_v6 = vpack.c.bf16 %v767_v20, %v765_v18 }
 0x4bb   :  { %v919_v28 = vpack.c.bf16 %v766_v24, %v764_v59 }
 0x4bd   :  { %912 = vmatpush1.bf16.msra.mxu0 %v911_v58 }
 0x4be   :  { %914 = vmatprep.subr.bf16.mxu0 %v913_v16 }
 0x4c1   :  { %916 = vmatpush1.bf16.msra.mxu0 %v915_v17 }
 0x4c2   :  { %918 = vmatprep.subr.bf16.mxu0 %v917_v6 }
 0x4c5   :  { %920 = vmatpush1.bf16.msra.mxu0 %v919_v28 }
 0x4c8   :  { %888 = vmatmul.mubr.msk.f32.vlgmr.msra.gmra.mrb[16].mxu0 %vm396_vm2, %v1284_v42 }
 0x59b   :  { %v834_v7 = vpop.f32.mrb[16].mxu0 }
 0x59c   :  { %v835_v26 = vadd.f32 %v834_v7, %v1396_v19  ;;  %v836_v25 = vpop.f32.mrb[17].mxu0 }
 0x59d   :  { %v837_v8 = vadd.f32 %v836_v25, %v1396_v19 }
 0x59e   :  { %v840_v30 = vadd.f32 %v1275_v12, %v835_v26 }
 0x59f   :  { %v841_v36 = vadd.f32 %v837_v8, %v1279_v23 }
 0x5a0   :  { %v842_v37 = vmax.f32 %v840_v30, 0.0 }
 0x5a1   :  { %v843_v45 = vmax.f32 %v841_v36, 0.0 }
 0x5a3   :  { %v846_v5 = vcombine.low %v842_v37, %v843_v45 }
 0x5a5   :  { %849 = vst [vmem:[#allocation2 + $0x8] sm:$0xff] %v846_v5 }
 0x5a6   :  { %1045 = shalt.err (!%p1042_p4)
}
 0x5a7   :  { %s1046_s8 = scalar_lea.hbm %s1438_s5, 256 }
 0x5a8   :  { %p1047_p5 = scmp.ne.s32.totalorder %s1438_s5, %s1046_s8  ;;  %p1050_p6 = scmp.lt.u32.totalorder %s1046_s8, %s1438_s5 }
 0x5aa   :  { %p1052_p7 = pnand %p1050_p6, %p1047_p5 }
 0x5ac   :  { %1055 = shalt.err (!%p1052_p7)
}
 0x5ad   :  { %s1061_s13 = smov 128   ;;  %s1062_s14 = smov 8  }
 0x5ae   :  { %861 = dma.vmem_to_hbm [thread:$0]  %s856_s29, 256, %s1438_s5, [#allocation3], %s1061_s13, %s1061_s13, %s1062_s14  }
 0x5af   :  { %1056 = dma.done.wait [#allocation3], 256  }
 0x5b0   :  { %1057 = vsyncadd [#allocation3], 4294967040 }
 0x5b1   :  { %865 = vsyncpa [#allocation3], 1 }

</bundles_post_ra>
